<compile_context>
chip_gen: v7x
topology: tpu7x:2x2x1
jax: 0.10.0
libtpu: 0.0.40
codegen_flags: <defaults>
</compile_context>

<pallas_src>
import jax
import jax.numpy as jnp
from jax.experimental import pallas as pl
from jax.experimental.pallas import tpu as pltpu


def gate_kernel(e_ref, z_ref, o_ref):
    # e_ref: (B_TILE, 16, 49)  lane-dense patch rows
    # z_ref: (B_TILE, 16, 1)   per-patch gate
    # o_ref: (B_TILE, 16, 49)
    # Single broadcast multiply + single full-tile store (pure VPU work).
    o_ref[...] = e_ref[...] * z_ref[...]


def multiply_forward(e_flat, z):
    """e_flat: (B, 784), z: (B, 16, 1) -> (B, 1, 28, 28)."""
    B = z.shape[0]
    dtype = e_flat.dtype

    # Layout plumbing (outside the kernel): flatten each 7x7 patch to 49 lanes.
    e3 = e_flat.reshape(B, 16, 49)
    z3 = z.reshape(B, 16, 1)

    # Batch tile: big enough to amortize per-step overhead, capped at 1024 so
    # double-buffered in+out blocks stay well inside v7x's 32 MiB scoped VMEM.
    b_tile = min(B, 1024)
    grid = (pl.cdiv(B, b_tile),)

    itemsize = jnp.dtype(dtype).itemsize
    cost = pl.CostEstimate(
        flops=B * 16 * 49,
        transcendentals=0,
        bytes_accessed=(2 * B * 16 * 49 + B * 16) * itemsize,
    )

    gated = pl.pallas_call(
        gate_kernel,
        out_shape=jax.ShapeDtypeStruct((B, 16, 49), dtype),
        grid=grid,
        in_specs=[
            pl.BlockSpec((b_tile, 16, 49), lambda i: (i, 0, 0)),
            pl.BlockSpec((b_tile, 16, 1), lambda i: (i, 0, 0)),
        ],
        out_specs=pl.BlockSpec((b_tile, 16, 49), lambda i: (i, 0, 0)),
        compiler_params=pltpu.CompilerParams(
            dimension_semantics=("parallel",),
        ),
        cost_estimate=cost,
    )(e3, z3)

    # Merge (layout plumbing in the wrapper): patch p = r*4 + c goes to output
    # rows [r*7:(r+1)*7), cols [c*7:(c+1)*7)  -- identical to torch.cat order.
    img = (
        gated.reshape(B, 4, 4, 7, 7)      # (B, r, c, h, w)
        .transpose(0, 1, 3, 2, 4)          # (B, r, h, c, w)
        .reshape(B, 28, 28)
    )
    return img[:, None, :, :]              # (B, 1, 28, 28)


def multiply_reference(e_flat, z):
    """Pure-JAX reference mirroring the PyTorch code exactly."""
    e4 = e_flat.reshape(-1, 16, 7, 7)
    out = e4 * z[:, :, :, None]
    patches = []
    for start in (0, 4, 8, 12):
        patch = [out[:, i, :, :] for i in range(start, start + 4)]
        patches.append(jnp.concatenate(patch, axis=-1))       # (B, 7, 28)
    img = jnp.concatenate(patches, axis=1)                    # (B, 28, 28)
    return img[:, None, :, :]                                 # (B, 1, 28, 28)


if __name__ == "__main__":
    key = jax.random.PRNGKey(0)
    k_e, k_z = jax.random.split(key)
    B = 2
    e_flat = jax.random.normal(k_e, (B, 16 * 7 * 7), dtype=jnp.float32)
    z = jax.random.normal(k_z, (B, 16, 1), dtype=jnp.float32)

    out = multiply_forward(e_flat, z)
    out = jax.block_until_ready(out)

    ref = multiply_reference(e_flat, z)
    assert out.shape == (B, 1, 28, 28), out.shape
    assert jnp.allclose(out, ref, atol=1e-6, rtol=1e-6), "mismatch vs reference"

    print("KERNEL_OK")
</pallas_src>

<mosaic_0001>
module attributes {stable_mosaic.version = 11 : i64} {
  func.func @gate_kernel(%arg0: i32, %arg1: memref<2x16x49xf32, #tpu.memory_space<vmem>>, %arg2: memref<2x16x1xf32, #tpu.memory_space<vmem>>, %arg3: memref<2x16x49xf32, #tpu.memory_space<vmem>>) attributes {dimension_semantics = [#tpu.dimension_semantics<parallel>], iteration_bounds = array<i64: 1>, scalar_prefetch = 0 : i64, scratch_operands = 0 : i64, tpu.core_type = #tpu.core_type<tc>, window_params = [{transform_indices = @transform_0, window_bounds = array<i64: 2, 16, 49>}, {transform_indices = @transform_1, window_bounds = array<i64: 2, 16, 1>}, {transform_indices = @transform_2, window_bounds = array<i64: 2, 16, 49>}]} {
    %c0 = arith.constant 0 : index
    %c0_0 = arith.constant 0 : index
    %c0_1 = arith.constant 0 : index
    %0 = vector.load %arg1[%c0, %c0_0, %c0_1] : memref<2x16x49xf32, #tpu.memory_space<vmem>>, vector<2x16x49xf32>
    %c0_2 = arith.constant 0 : index
    %c0_3 = arith.constant 0 : index
    %c0_4 = arith.constant 0 : index
    %1 = vector.load %arg2[%c0_2, %c0_3, %c0_4] : memref<2x16x1xf32, #tpu.memory_space<vmem>>, vector<2x16x1xf32>
    %2 = vector.broadcast %1 : vector<2x16x1xf32> to vector<2x16x49xf32>
    %3 = arith.mulf %0, %2 : vector<2x16x49xf32>
    %c0_5 = arith.constant 0 : index
    %c0_6 = arith.constant 0 : index
    %c0_7 = arith.constant 0 : index
    %4 = vector.load %arg3[%c0_5, %c0_6, %c0_7] : memref<2x16x49xf32, #tpu.memory_space<vmem>>, vector<2x16x49xf32>
    tpu.vector_store %arg3[%c0_5, %c0_6, %c0_7], %3 {strides = array<i32>} : memref<2x16x49xf32, #tpu.memory_space<vmem>>, vector<2x16x49xf32>,
    return
  }
  func.func @transform_0(%arg0: i32) -> (i32, i32, i32) {
    %c0_i32 = arith.constant 0 : i32
    %c0_i32_0 = arith.constant 0 : i32
    %c0_i32_1 = arith.constant 0 : i32
    return %arg0, %c0_i32, %c0_i32_0 : i32, i32, i32
  }
  func.func @transform_1(%arg0: i32) -> (i32, i32, i32) {
    %c0_i32 = arith.constant 0 : i32
    %c0_i32_0 = arith.constant 0 : i32
    %c0_i32_1 = arith.constant 0 : i32
    return %arg0, %c0_i32, %c0_i32_0 : i32, i32, i32
  }
  func.func @transform_2(%arg0: i32) -> (i32, i32, i32) {
    %c0_i32 = arith.constant 0 : i32
    %c0_i32_0 = arith.constant 0 : i32
    %c0_i32_1 = arith.constant 0 : i32
    return %arg0, %c0_i32, %c0_i32_0 : i32, i32, i32
  }
}

</mosaic_0001>

<bundles_post_ra>
// kernel: tpu_custom_call.1
= control target key start
LH: loop header
LB: loop body
LE: loop exit
PB: predicated region body
PF: predicated region fallthrough
CT: control target
= control target key end

     0   :  { %v95_v2 = vmov 0   ;;  %s154_s0 = inlined_call_operand.vmem [shape: f32[2,16,49], index: 0, kind: input, shape index: {}]   ;;  %s155_s1 = inlined_call_operand.vmem [shape: f32[2,16,1], index: 1, kind: input, shape index: {}]   ;;  %s156_s2 = inlined_call_operand.hbm [shape: f32[2,16,49], index: 2, kind: output, shape index: {}]  }
   0x1   :  { %v18_v0 = vld [vmem:[%s155_s1 + $0x10] sm:$0xff]  ;;  %v16_v1 = vld [vmem:[%s155_s1] sm:$0xff]  ;;  %70 = vset.pattern.permute.xlu1 %v95_v2  ;;  %69 = vset.pattern.permute.xlu0 %v95_v2 }
   0x2   :  { %32 = vperm.xlu1 %70, %v18_v0   ;;  %22 = vperm.xlu0 %69, %v16_v1  }
   0x3   :  { %7 = vsyncpa [#allocation3], 0  ;;  %v19_v3 = vld [vmem:[%s155_s1 + $0x18] sm:$0xff]  ;;  %v17_v4 = vld [vmem:[%s155_s1 + $0x8] sm:$0xff]  ;;  %vm44_vm0 = vcmask 400384   ;;  %s96_s21 = smov [#allocation2]  }
   0x4   :  { %v14_v5 = vld [vmem:[%s154_s0 + $0x10] sm:$0xff]  ;;  %v12_v6 = vld [vmem:[%s154_s0] sm:$0xff]  ;;  %s54_s22 = sshll.u32 %s96_s21, 4  ;;  %v15_v11 = vld [vmem:[%s154_s0 + $0x18] sm:$0xff]  ;;  %s55_s22 = int_to_ptr.vmem [resolvable:$true] %s54_s22 }
   0x5   :  { %v13_v12 = vld [vmem:[%s154_s0 + $0x8] sm:$0xff]  ;;  %s71_s26 = scalar_lea.vmem %s55_s22, 512  ;;  %p76_p1 = scmp.lt.s32.totalorder %s55_s22, %s55_s22 }
   0x6   :  { %37 = vperm.xlu1 %70, %v19_v3   ;;  %27 = vperm.xlu0 %69, %v17_v4   ;;  %p72_p0 = scmp.ne.s32.totalorder %s55_s22, %s71_s26  ;;  %p77_p2 = scmp.lt.s32.totalorder %s71_s26, %s71_s26 }
   0x8   :  { %p78_p3 = por %p77_p2, %p76_p1 }
   0xa   :  { %p79_p4 = pnand %p78_p3, %p72_p0 }
  0x81   :  { %v33_v7 = vpop.permute.xlu1 %32  ;;  %v23_v8 = vpop.permute.xlu0 %22 }
  0x82   :  { %v42_v9 = vmul.f32 %v33_v7, %v14_v5  ;;  %v40_v10 = vmul.f32 %v23_v8, %v12_v6 }
  0x84   :  { %47 = vst.msk [vmem:[#allocation2 + $0x10] sm:$0xff] %vm44_vm0, %v42_v9  ;;  %45 = vst.msk [vmem:[#allocation2] sm:$0xff] %vm44_vm0, %v40_v10 }
  0x85   :  { %v38_v13 = vpop.permute.xlu1 %37  ;;  %v28_v14 = vpop.permute.xlu0 %27 }
  0x86   :  { %v43_v15 = vmul.f32 %v38_v13, %v15_v11  ;;  %v41_v16 = vmul.f32 %v28_v14, %v13_v12 }
  0x88   :  { %48 = vst.msk [vmem:[#allocation2 + $0x18] sm:$0xff] %vm44_vm0, %v43_v15  ;;  %46 = vst.msk [vmem:[#allocation2 + $0x8] sm:$0xff] %vm44_vm0, %v41_v16 }
  0x89   :  { %82 = shalt.err (!%p79_p4)
}
  0x8a   :  { %s83_s28 = scalar_lea.hbm %s156_s2, 512 }
  0x8b   :  { %p84_p5 = scmp.ne.s32.totalorder %s156_s2, %s83_s28  ;;  %p87_p6 = scmp.lt.u32.totalorder %s83_s28, %s156_s2 }
  0x8d   :  { %p89_p7 = pnand %p87_p6, %p84_p5 }
  0x8f   :  { %92 = shalt.err (!%p89_p7)
}
  0x90   :  { %s97_s5 = smov 128   ;;  %s98_s6 = smov 8  }
  0x91   :  { %60 = dma.vmem_to_hbm [thread:$0]  %s55_s22, 512, %s156_s2, [#allocation3], %s97_s5, %s97_s5, %s98_s6  }
  0x92   :  { %93 = dma.done.wait [#allocation3], 512  }
  0x93   :  { %94 = vsyncadd [#allocation3], 4294966784 }
  0x94   :  { %64 = vsyncpa [#allocation3], 1 }

</bundles_post_ra>
